<compile_context>
chip_gen: v7x
topology: tpu7x:2x2x1
jax: 0.10.0
libtpu: 0.0.40
codegen_flags: <defaults>
</compile_context>

<pallas_src>
import functools

import jax
import jax.numpy as jnp
from jax.experimental import pallas as pl
from jax.experimental.pallas import tpu as pltpu


# ----------------------------------------------------------------------------
# One-time TPU-generation detection.  Used only for perf knobs (VMEM cap,
# epilogue dtype, demo tile choice), never for correctness.
# ----------------------------------------------------------------------------
def _device_kind():
    try:
        return jax.devices()[0].device_kind.lower()
    except Exception:  # pragma: no cover - defensive
        return ""


_KIND = _device_kind()
_IS_V7X = "7" in _KIND            # v7x: 2 TensorCores/chip, 64 MiB VMEM
_IS_V5E = "v5" in _KIND           # v5e: no native bf16 VPU path
_VMEM_CAP = (48 << 20) if _IS_V7X else (100 << 20)
_BF16_EPILOGUE = not _IS_V5E      # bf16 bias-add/ReLU on v6e/v7x only


def _toy_model_kernel(x_ref,
                      w1_ref, b1_ref,
                      w2_ref, b2_ref,
                      w3_ref, b3_ref,
                      w4_ref, b4_ref,
                      hw_ref, hb_ref,
                      out_ref):
    """relu(relu(relu(relu(x@W1+b1)@W2+b2)@W3+b3)@W4+b4) @ HW_flat + hb_flat."""
    compute_dtype = w1_ref.dtype

    def _layer(h, w_ref, b_ref):
        # MXU matmul with f32 accumulation; bias-add + ReLU in the bias dtype
        # (bf16 on v6e/v7x -> half the VPU vreg pressure and no f32 round-trip,
        # f32 on v5e), then back to the MXU operand dtype for the next layer
        # (a no-op on the all-bf16 path).
        z = jnp.dot(h, w_ref[...], preferred_element_type=jnp.float32)
        z = z.astype(b_ref.dtype)
        return jnp.maximum(z + b_ref[...], 0.0).astype(compute_dtype)

    h = _layer(x_ref[...], w1_ref, b1_ref)
    h = _layer(h, w2_ref, b2_ref)
    h = _layer(h, w3_ref, b3_ref)
    h = _layer(h, w4_ref, b4_ref)

    # All T heads as one wide matmul -> lane-dense [tb, T*O] store.
    out = jnp.dot(h, hw_ref[...], preferred_element_type=jnp.float32)
    out = out.astype(hb_ref.dtype) + hb_ref[...]
    out_ref[...] = out.astype(out_ref.dtype)


def _padded_vmem_bytes(shape, dtype):
    """VMEM footprint of one buffer of a 2-D array under (sublane,128) tiling."""
    dt = jnp.dtype(dtype)
    packing = max(1, 4 // dt.itemsize)      # sub-32-bit dtypes pack along sublanes
    sublane = 8 * packing
    rows = shape[0] if len(shape) >= 2 else 1
    cols = shape[-1]
    rows_p = -(-rows // sublane) * sublane
    cols_p = -(-cols // 128) * 128
    return rows_p * cols_p * dt.itemsize


@functools.partial(jax.jit,
                   static_argnames=("num_heads", "block_b", "out_dtype",
                                    "single_buffer_weights"))
def toy_model_forward(x, kparams, *, num_heads, block_b=512,
                      out_dtype=jnp.float32, single_buffer_weights=True):
    """x: [B, input_dim] -> [B, T, output_dim] (matches torch.stack(..., dim=1))."""
    (w1, b1, w2, b2, w3, b3, w4, b4, hw_flat, hb_flat) = kparams
    B, D = x.shape
    H = w1.shape[1]
    TO = hw_flat.shape[1]
    O = TO // num_heads

    compute_dtype = w1.dtype
    x = x.astype(compute_dtype)

    # Fixed (tb, ...) batch tile + cdiv grid; Pallas handles the ragged last
    # block (padded output rows are discarded).  tb is kept sublane-aligned.
    tb = min(block_b, B)
    if tb != B:
        tb = max(8, (tb // 8) * 8)
    grid = (pl.cdiv(B, tb),)

    x_spec = pl.BlockSpec((tb, D), lambda i: (i, 0))
    out_spec = pl.BlockSpec((tb, TO), lambda i: (i, 0))

    weight_args = (w1, b1, w2, b2, w3, b3, w4, b4, hw_flat, hb_flat)

    def _resident(arr):
        # Constant index_map: the block is DMA'd once and stays resident.
        if single_buffer_weights:
            return pl.BlockSpec(arr.shape, lambda i: (0, 0),
                                pipeline_mode=pl.Buffered(1))
        return pl.BlockSpec(arr.shape, lambda i: (0, 0))

    in_specs = [x_spec] + [_resident(a) for a in weight_args]

    # Cost estimate (advisory, for XLA scheduling around the custom call).
    itemsize = jnp.dtype(compute_dtype).itemsize
    flops = 2 * B * (D * H + 3 * H * H + H * TO)
    bytes_accessed = (int(x.size) * itemsize
                      + sum(int(a.size) * a.dtype.itemsize for a in weight_args)
                      + B * TO * jnp.dtype(out_dtype).itemsize)
    cost = pl.CostEstimate(flops=int(flops), transcendentals=0,
                           bytes_accessed=int(bytes_accessed))

    # VMEM budget from padded (sublane,128)-tiled footprints:
    #   resident weights (1 or 2 buffers) + double-buffered x/out streams
    #   + intermediate activation tiles + slack.  Capped per generation.
    n_buf_w = 1 if single_buffer_weights else 2
    weight_vmem = n_buf_w * sum(_padded_vmem_bytes(a.shape, a.dtype)
                                for a in weight_args)
    stream_vmem = 2 * (_padded_vmem_bytes((tb, D), compute_dtype)
                       + _padded_vmem_bytes((tb, TO), out_dtype))
    act_vmem = 4 * _padded_vmem_bytes((tb, max(H, TO)), jnp.float32)
    vmem_limit = int(min(max(weight_vmem + stream_vmem + act_vmem + (4 << 20),
                             16 << 20), _VMEM_CAP))

    out_flat = pl.pallas_call(
        _toy_model_kernel,
        out_shape=jax.ShapeDtypeStruct((B, TO), out_dtype),
        grid=grid,
        in_specs=in_specs,
        out_specs=out_spec,
        compiler_params=pltpu.CompilerParams(
            dimension_semantics=("parallel",),
            vmem_limit_bytes=vmem_limit),
        cost_estimate=cost,
    )(x, *weight_args)

    # [B, T*O] -> [B, T, O]: plain reshape, no transpose / HBM round-trip.
    return out_flat.reshape(B, num_heads, O)


def init_params(key, T, input_dim, hidden_dim, output_dim):
    """Deterministic synthetic init (uniform, PyTorch-Linear-like bounds), f32."""
    keys = jax.random.split(key, 10)

    def lin(kw, kb, fan_in, fan_out):
        bound = 1.0 / jnp.sqrt(jnp.float32(fan_in))
        w = jax.random.uniform(kw, (fan_in, fan_out), jnp.float32, -bound, bound)
        b = jax.random.uniform(kb, (fan_out,), jnp.float32, -bound, bound)
        return w, b

    w1, b1 = lin(keys[0], keys[1], input_dim, hidden_dim)
    w2, b2 = lin(keys[2], keys[3], hidden_dim, hidden_dim)
    w3, b3 = lin(keys[4], keys[5], hidden_dim, hidden_dim)
    w4, b4 = lin(keys[6], keys[7], hidden_dim, hidden_dim)

    bound = 1.0 / jnp.sqrt(jnp.float32(hidden_dim))
    hw = jax.random.uniform(keys[8], (T, hidden_dim, output_dim),
                            jnp.float32, -bound, bound)
    hb = jax.random.uniform(keys[9], (T, output_dim),
                            jnp.float32, -bound, bound)
    return (w1, b1, w2, b2, w3, b3, w4, b4, hw, hb)


def prepare_kernel_params(params, compute_dtype=jnp.bfloat16, bias_dtype=None):
    """One-time relayout into the kernel-preferred format.

    Weights cast to `compute_dtype` (bf16 for MXU peak).  Biases are cast to
    `bias_dtype`: by default the compute dtype on v6e/v7x (bf16 epilogue) and
    f32 on v5e (no bf16 VPU).  Head weights flattened [T,H,O] -> [H, T*O].
    """
    (w1, b1, w2, b2, w3, b3, w4, b4, hw, hb) = params
    T, H, O = hw.shape

    if bias_dtype is None:
        if jnp.dtype(compute_dtype) == jnp.dtype(jnp.float32) or _BF16_EPILOGUE:
            bias_dtype = compute_dtype
        else:
            bias_dtype = jnp.float32

    hw_flat = jnp.transpose(hw, (1, 0, 2)).reshape(H, T * O).astype(compute_dtype)
    hb_flat = hb.reshape(1, T * O).astype(bias_dtype)

    def cast_w(w):
        return w.astype(compute_dtype)

    def prep_b(b):
        return b.reshape(1, -1).astype(bias_dtype)

    return (cast_w(w1), prep_b(b1),
            cast_w(w2), prep_b(b2),
            cast_w(w3), prep_b(b3),
            cast_w(w4), prep_b(b4),
            hw_flat, hb_flat)


def reference_forward(x, params):
    """Pure-JAX f32 reference matching the PyTorch module."""
    (w1, b1, w2, b2, w3, b3, w4, b4, hw, hb) = params
    h = jax.nn.relu(x @ w1 + b1)
    h = jax.nn.relu(h @ w2 + b2)
    h = jax.nn.relu(h @ w3 + b3)
    h = jax.nn.relu(h @ w4 + b4)
    return jnp.einsum('bh,tho->bto', h, hw) + hb[None, :, :]


if __name__ == "__main__":
    # Small shapes consistent with the module's forward.
    # T * OUTPUT_DIM = 128 so the kernel's output slab is lane-dense.
    T = 4
    B = 64
    INPUT_DIM = 32
    HIDDEN_DIM = 32
    OUTPUT_DIM = 32

    key = jax.random.PRNGKey(0)
    k_x, k_p = jax.random.split(key)
    x = jax.random.normal(k_x, (B, INPUT_DIM), jnp.float32)
    params = init_params(k_p, T, INPUT_DIM, HIDDEN_DIM, OUTPUT_DIM)
    ref = reference_forward(x, params)

    # Don't split a trivially small batch on 1-TC chips (v5e/v6e: grid steps
    # are a sequential loop); give v7x's 2 TensorCores a 2-step parallel grid.
    block_b = 32 if _IS_V7X else 64

    state = {"single_buffer": True}

    def run(kp, out_dtype):
        try:
            return jax.block_until_ready(
                toy_model_forward(x, kp, num_heads=T, block_b=block_b,
                                  out_dtype=out_dtype,
                                  single_buffer_weights=state["single_buffer"]))
        except Exception:
            # pl.Buffered(1) resident-weight specs not supported by this jax
            # build; fall back to default double-buffered specs (weights are
            # tiny, so the cost is negligible).
            state["single_buffer"] = False
            return jax.block_until_ready(
                toy_model_forward(x, kp, num_heads=T, block_b=block_b,
                                  out_dtype=out_dtype,
                                  single_buffer_weights=False))

    # f32-operand path: tight numerical check against the pure-JAX reference.
    kp_f32 = prepare_kernel_params(params, jnp.float32)
    out_f32 = run(kp_f32, jnp.float32)
    assert out_f32.shape == (B, T, OUTPUT_DIM), out_f32.shape
    assert jnp.allclose(out_f32, ref, atol=1e-5, rtol=1e-5), "f32 mismatch vs reference"

    # bf16-operand path (MXU-native), f32 accumulation, bf16 epilogue on v6e/v7x.
    kp_bf16 = prepare_kernel_params(params, jnp.bfloat16)
    out_bf16 = run(kp_bf16, jnp.float32)
    assert out_bf16.shape == (B, T, OUTPUT_DIM), out_bf16.shape
    assert jnp.allclose(out_bf16, ref, atol=8e-2, rtol=8e-2), "bf16 mismatch vs reference"

    # bf16 output slab: halves the dominant HBM writeback traffic at large B.
    out_bf16_out = run(kp_bf16, jnp.bfloat16)
    assert out_bf16_out.shape == (B, T, OUTPUT_DIM)
    assert out_bf16_out.dtype == jnp.bfloat16
    assert jnp.allclose(out_bf16_out.astype(jnp.float32), out_bf16,
                        atol=3e-2, rtol=3e-2), "bf16-out mismatch vs f32-out"

    print("KERNEL_OK")
</pallas_src>

<mosaic_0001>
module attributes {stable_mosaic.version = 11 : i64} {
  func.func @_toy_model_kernel(%arg0: i32, %arg1: memref<64x32xf32, #tpu.memory_space<vmem>>, %arg2: memref<32x32xf32, #tpu.memory_space<vmem>>, %arg3: memref<1x32xf32, #tpu.memory_space<vmem>>, %arg4: memref<32x32xf32, #tpu.memory_space<vmem>>, %arg5: memref<1x32xf32, #tpu.memory_space<vmem>>, %arg6: memref<32x32xf32, #tpu.memory_space<vmem>>, %arg7: memref<1x32xf32, #tpu.memory_space<vmem>>, %arg8: memref<32x32xf32, #tpu.memory_space<vmem>>, %arg9: memref<1x32xf32, #tpu.memory_space<vmem>>, %arg10: memref<32x128xf32, #tpu.memory_space<vmem>>, %arg11: memref<1x128xf32, #tpu.memory_space<vmem>>, %arg12: memref<64x128xf32, #tpu.memory_space<vmem>>) attributes {dimension_semantics = [#tpu.dimension_semantics<parallel>], iteration_bounds = array<i64: 1>, scalar_prefetch = 0 : i64, scratch_operands = 0 : i64, tpu.core_type = #tpu.core_type<tc>, window_params = [{transform_indices = @transform_0, window_bounds = array<i64: 64, 32>}, {pipeline_mode = #tpu.pipeline_mode<synchronous>, transform_indices = @transform_1, window_bounds = array<i64: 32, 32>}, {pipeline_mode = #tpu.pipeline_mode<synchronous>, transform_indices = @transform_2, window_bounds = array<i64: 1, 32>}, {pipeline_mode = #tpu.pipeline_mode<synchronous>, transform_indices = @transform_3, window_bounds = array<i64: 32, 32>}, {pipeline_mode = #tpu.pipeline_mode<synchronous>, transform_indices = @transform_4, window_bounds = array<i64: 1, 32>}, {pipeline_mode = #tpu.pipeline_mode<synchronous>, transform_indices = @transform_5, window_bounds = array<i64: 32, 32>}, {pipeline_mode = #tpu.pipeline_mode<synchronous>, transform_indices = @transform_6, window_bounds = array<i64: 1, 32>}, {pipeline_mode = #tpu.pipeline_mode<synchronous>, transform_indices = @transform_7, window_bounds = array<i64: 32, 32>}, {pipeline_mode = #tpu.pipeline_mode<synchronous>, transform_indices = @transform_8, window_bounds = array<i64: 1, 32>}, {pipeline_mode = #tpu.pipeline_mode<synchronous>, transform_indices = @transform_9, window_bounds = array<i64: 32, 128>}, {pipeline_mode = #tpu.pipeline_mode<synchronous>, transform_indices = @transform_10, window_bounds = array<i64: 1, 128>}, {transform_indices = @transform_11, window_bounds = array<i64: 64, 128>}]} {
    %c0 = arith.constant 0 : index
    %c0_0 = arith.constant 0 : index
    %0 = vector.load %arg1[%c0, %c0_0] : memref<64x32xf32, #tpu.memory_space<vmem>>, vector<64x32xf32>
    %c0_1 = arith.constant 0 : index
    %c0_2 = arith.constant 0 : index
    %1 = vector.load %arg2[%c0_1, %c0_2] : memref<32x32xf32, #tpu.memory_space<vmem>>, vector<32x32xf32>
    %cst = arith.constant dense<0.000000e+00> : vector<64x32xf32>
    %2 = tpu.matmul %0, %1, %cst {dimension_numbers = #tpu.dot_dimension_numbers<[1], [0], [0], [1], [0, 0, 1, 1], [], []>} : vector<64x32xf32>, vector<32x32xf32>, vector<64x32xf32> -> vector<64x32xf32>
    %c0_3 = arith.constant 0 : index
    %c0_4 = arith.constant 0 : index
    %3 = vector.load %arg3[%c0_3, %c0_4] : memref<1x32xf32, #tpu.memory_space<vmem>>, vector<1x32xf32>
    %4 = vector.broadcast %3 : vector<1x32xf32> to vector<64x32xf32>
    %5 = arith.addf %2, %4 : vector<64x32xf32>
    %cst_5 = arith.constant 0.000000e+00 : f32
    %6 = vector.broadcast %cst_5 : f32 to vector<64x32xf32>
    %7 = arith.maximumf %5, %6 : vector<64x32xf32>
    %c0_6 = arith.constant 0 : index
    %c0_7 = arith.constant 0 : index
    %8 = vector.load %arg4[%c0_6, %c0_7] : memref<32x32xf32, #tpu.memory_space<vmem>>, vector<32x32xf32>
    %cst_8 = arith.constant dense<0.000000e+00> : vector<64x32xf32>
    %9 = tpu.matmul %7, %8, %cst_8 {dimension_numbers = #tpu.dot_dimension_numbers<[1], [0], [0], [1], [0, 0, 1, 1], [], []>} : vector<64x32xf32>, vector<32x32xf32>, vector<64x32xf32> -> vector<64x32xf32>
    %c0_9 = arith.constant 0 : index
    %c0_10 = arith.constant 0 : index
    %10 = vector.load %arg5[%c0_9, %c0_10] : memref<1x32xf32, #tpu.memory_space<vmem>>, vector<1x32xf32>
    %11 = vector.broadcast %10 : vector<1x32xf32> to vector<64x32xf32>
    %12 = arith.addf %9, %11 : vector<64x32xf32>
    %cst_11 = arith.constant 0.000000e+00 : f32
    %13 = vector.broadcast %cst_11 : f32 to vector<64x32xf32>
    %14 = arith.maximumf %12, %13 : vector<64x32xf32>
    %c0_12 = arith.constant 0 : index
    %c0_13 = arith.constant 0 : index
    %15 = vector.load %arg6[%c0_12, %c0_13] : memref<32x32xf32, #tpu.memory_space<vmem>>, vector<32x32xf32>
    %cst_14 = arith.constant dense<0.000000e+00> : vector<64x32xf32>
    %16 = tpu.matmul %14, %15, %cst_14 {dimension_numbers = #tpu.dot_dimension_numbers<[1], [0], [0], [1], [0, 0, 1, 1], [], []>} : vector<64x32xf32>, vector<32x32xf32>, vector<64x32xf32> -> vector<64x32xf32>
    %c0_15 = arith.constant 0 : index
    %c0_16 = arith.constant 0 : index
    %17 = vector.load %arg7[%c0_15, %c0_16] : memref<1x32xf32, #tpu.memory_space<vmem>>, vector<1x32xf32>
    %18 = vector.broadcast %17 : vector<1x32xf32> to vector<64x32xf32>
    %19 = arith.addf %16, %18 : vector<64x32xf32>
    %cst_17 = arith.constant 0.000000e+00 : f32
    %20 = vector.broadcast %cst_17 : f32 to vector<64x32xf32>
    %21 = arith.maximumf %19, %20 : vector<64x32xf32>
    %c0_18 = arith.constant 0 : index
    %c0_19 = arith.constant 0 : index
    %22 = vector.load %arg8[%c0_18, %c0_19] : memref<32x32xf32, #tpu.memory_space<vmem>>, vector<32x32xf32>
    %cst_20 = arith.constant dense<0.000000e+00> : vector<64x32xf32>
    %23 = tpu.matmul %21, %22, %cst_20 {dimension_numbers = #tpu.dot_dimension_numbers<[1], [0], [0], [1], [0, 0, 1, 1], [], []>} : vector<64x32xf32>, vector<32x32xf32>, vector<64x32xf32> -> vector<64x32xf32>
    %c0_21 = arith.constant 0 : index
    %c0_22 = arith.constant 0 : index
    %24 = vector.load %arg9[%c0_21, %c0_22] : memref<1x32xf32, #tpu.memory_space<vmem>>, vector<1x32xf32>
    %25 = vector.broadcast %24 : vector<1x32xf32> to vector<64x32xf32>
    %26 = arith.addf %23, %25 : vector<64x32xf32>
    %cst_23 = arith.constant 0.000000e+00 : f32
    %27 = vector.broadcast %cst_23 : f32 to vector<64x32xf32>
    %28 = arith.maximumf %26, %27 : vector<64x32xf32>
    %c0_24 = arith.constant 0 : index
    %c0_25 = arith.constant 0 : index
    %29 = vector.load %arg10[%c0_24, %c0_25] : memref<32x128xf32, #tpu.memory_space<vmem>>, vector<32x128xf32>
    %cst_26 = arith.constant dense<0.000000e+00> : vector<64x128xf32>
    %30 = tpu.matmul %28, %29, %cst_26 {dimension_numbers = #tpu.dot_dimension_numbers<[1], [0], [0], [1], [0, 0, 1, 1], [], []>} : vector<64x32xf32>, vector<32x128xf32>, vector<64x128xf32> -> vector<64x128xf32>
    %c0_27 = arith.constant 0 : index
    %c0_28 = arith.constant 0 : index
    %31 = vector.load %arg11[%c0_27, %c0_28] : memref<1x128xf32, #tpu.memory_space<vmem>>, vector<1x128xf32>
    %32 = vector.broadcast %31 : vector<1x128xf32> to vector<64x128xf32>
    %33 = arith.addf %30, %32 : vector<64x128xf32>
    %c0_29 = arith.constant 0 : index
    %c0_30 = arith.constant 0 : index
    %34 = vector.load %arg12[%c0_29, %c0_30] : memref<64x128xf32, #tpu.memory_space<vmem>>, vector<64x128xf32>
    tpu.vector_store %arg12[%c0_29, %c0_30], %33 {strides = array<i32>} : memref<64x128xf32, #tpu.memory_space<vmem>>, vector<64x128xf32>,
    return
  }
  func.func @transform_0(%arg0: i32) -> (i32, i32) {
    %c0_i32 = arith.constant 0 : i32
    %c0_i32_0 = arith.constant 0 : i32
    return %arg0, %c0_i32 : i32, i32
  }
  func.func @transform_1(%arg0: i32) -> (i32, i32) {
    %c0_i32 = arith.constant 0 : i32
    %c0_i32_0 = arith.constant 0 : i32
    %c0_i32_1 = arith.constant 0 : i32
    return %c0_i32, %c0_i32_0 : i32, i32
  }
  func.func @transform_2(%arg0: i32) -> (i32, i32) {
    %c0_i32 = arith.constant 0 : i32
    %c0_i32_0 = arith.constant 0 : i32
    %c0_i32_1 = arith.constant 0 : i32
    return %c0_i32, %c0_i32_0 : i32, i32
  }
  func.func @transform_3(%arg0: i32) -> (i32, i32) {
    %c0_i32 = arith.constant 0 : i32
    %c0_i32_0 = arith.constant 0 : i32
    %c0_i32_1 = arith.constant 0 : i32
    return %c0_i32, %c0_i32_0 : i32, i32
  }
  func.func @transform_4(%arg0: i32) -> (i32, i32) {
    %c0_i32 = arith.constant 0 : i32
    %c0_i32_0 = arith.constant 0 : i32
    %c0_i32_1 = arith.constant 0 : i32
    return %c0_i32, %c0_i32_0 : i32, i32
  }
  func.func @transform_5(%arg0: i32) -> (i32, i32) {
    %c0_i32 = arith.constant 0 : i32
    %c0_i32_0 = arith.constant 0 : i32
    %c0_i32_1 = arith.constant 0 : i32
    return %c0_i32, %c0_i32_0 : i32, i32
  }
  func.func @transform_6(%arg0: i32) -> (i32, i32) {
    %c0_i32 = arith.constant 0 : i32
    %c0_i32_0 = arith.constant 0 : i32
    %c0_i32_1 = arith.constant 0 : i32
    return %c0_i32, %c0_i32_0 : i32, i32
  }
  func.func @transform_7(%arg0: i32) -> (i32, i32) {
    %c0_i32 = arith.constant 0 : i32
    %c0_i32_0 = arith.constant 0 : i32
    %c0_i32_1 = arith.constant 0 : i32
    return %c0_i32, %c0_i32_0 : i32, i32
  }
  func.func @transform_8(%arg0: i32) -> (i32, i32) {
    %c0_i32 = arith.constant 0 : i32
    %c0_i32_0 = arith.constant 0 : i32
    %c0_i32_1 = arith.constant 0 : i32
    return %c0_i32, %c0_i32_0 : i32, i32
  }
  func.func @transform_9(%arg0: i32) -> (i32, i32) {
    %c0_i32 = arith.constant 0 : i32
    %c0_i32_0 = arith.constant 0 : i32
    %c0_i32_1 = arith.constant 0 : i32
    return %c0_i32, %c0_i32_0 : i32, i32
  }
  func.func @transform_10(%arg0: i32) -> (i32, i32) {
    %c0_i32 = arith.constant 0 : i32
    %c0_i32_0 = arith.constant 0 : i32
    %c0_i32_1 = arith.constant 0 : i32
    return %c0_i32, %c0_i32_0 : i32, i32
  }
  func.func @transform_11(%arg0: i32) -> (i32, i32) {
    %c0_i32 = arith.constant 0 : i32
    %c0_i32_0 = arith.constant 0 : i32
    return %arg0, %c0_i32 : i32, i32
  }
}

module attributes {stable_mosaic.version = 11 : i64} {
  func.func @_toy_model_kernel(%arg0: i32, %arg1: memref<64x32xf32, #tpu.memory_space<vmem>>, %arg2: memref<32x32xf32, #tpu.memory_space<vmem>>, %arg3: memref<1x32xf32, #tpu.memory_space<vmem>>, %arg4: memref<32x32xf32, #tpu.memory_space<vmem>>, %arg5: memref<1x32xf32, #tpu.memory_space<vmem>>, %arg6: memref<32x32xf32, #tpu.memory_space<vmem>>, %arg7: memref<1x32xf32, #tpu.memory_space<vmem>>, %arg8: memref<32x32xf32, #tpu.memory_space<vmem>>, %arg9: memref<1x32xf32, #tpu.memory_space<vmem>>, %arg10: memref<32x128xf32, #tpu.memory_space<vmem>>, %arg11: memref<1x128xf32, #tpu.memory_space<vmem>>, %arg12: memref<64x128xf32, #tpu.memory_space<vmem>>) attributes {dimension_semantics = [#tpu.dimension_semantics<parallel>], iteration_bounds = array<i64: 1>, scalar_prefetch = 0 : i64, scratch_operands = 0 : i64, tpu.core_type = #tpu.core_type<tc>, window_params = [{transform_indices = @transform_0, window_bounds = array<i64: 64, 32>}, {pipeline_mode = #tpu.pipeline_mode<synchronous>, transform_indices = @transform_1, window_bounds = array<i64: 32, 32>}, {pipeline_mode = #tpu.pipeline_mode<synchronous>, transform_indices = @transform_2, window_bounds = array<i64: 1, 32>}, {pipeline_mode = #tpu.pipeline_mode<synchronous>, transform_indices = @transform_3, window_bounds = array<i64: 32, 32>}, {pipeline_mode = #tpu.pipeline_mode<synchronous>, transform_indices = @transform_4, window_bounds = array<i64: 1, 32>}, {pipeline_mode = #tpu.pipeline_mode<synchronous>, transform_indices = @transform_5, window_bounds = array<i64: 32, 32>}, {pipeline_mode = #tpu.pipeline_mode<synchronous>, transform_indices = @transform_6, window_bounds = array<i64: 1, 32>}, {pipeline_mode = #tpu.pipeline_mode<synchronous>, transform_indices = @transform_7, window_bounds = array<i64: 32, 32>}, {pipeline_mode = #tpu.pipeline_mode<synchronous>, transform_indices = @transform_8, window_bounds = array<i64: 1, 32>}, {pipeline_mode = #tpu.pipeline_mode<synchronous>, transform_indices = @transform_9, window_bounds = array<i64: 32, 128>}, {pipeline_mode = #tpu.pipeline_mode<synchronous>, transform_indices = @transform_10, window_bounds = array<i64: 1, 128>}, {transform_indices = @transform_11, window_bounds = array<i64: 64, 128>}]} {
    %c0 = arith.constant 0 : index
    %c0_0 = arith.constant 0 : index
    %0 = vector.load %arg1[%c0, %c0_0] : memref<64x32xf32, #tpu.memory_space<vmem>>, vector<64x32xf32>
    %c0_1 = arith.constant 0 : index
    %c0_2 = arith.constant 0 : index
    %1 = vector.load %arg2[%c0_1, %c0_2] : memref<32x32xf32, #tpu.memory_space<vmem>>, vector<32x32xf32>
    %cst = arith.constant dense<0.000000e+00> : vector<64x32xf32>
    %2 = tpu.matmul %0, %1, %cst {dimension_numbers = #tpu.dot_dimension_numbers<[1], [0], [0], [1], [0, 0, 1, 1], [], []>} : vector<64x32xf32>, vector<32x32xf32>, vector<64x32xf32> -> vector<64x32xf32>
    %c0_3 = arith.constant 0 : index
    %c0_4 = arith.constant 0 : index
    %3 = vector.load %arg3[%c0_3, %c0_4] : memref<1x32xf32, #tpu.memory_space<vmem>>, vector<1x32xf32>
    %4 = vector.broadcast %3 : vector<1x32xf32> to vector<64x32xf32>
    %5 = arith.addf %2, %4 : vector<64x32xf32>
    %cst_5 = arith.constant 0.000000e+00 : f32
    %6 = vector.broadcast %cst_5 : f32 to vector<64x32xf32>
    %7 = arith.maximumf %5, %6 : vector<64x32xf32>
    %c0_6 = arith.constant 0 : index
    %c0_7 = arith.constant 0 : index
    %8 = vector.load %arg4[%c0_6, %c0_7] : memref<32x32xf32, #tpu.memory_space<vmem>>, vector<32x32xf32>
    %cst_8 = arith.constant dense<0.000000e+00> : vector<64x32xf32>
    %9 = tpu.matmul %7, %8, %cst_8 {dimension_numbers = #tpu.dot_dimension_numbers<[1], [0], [0], [1], [0, 0, 1, 1], [], []>} : vector<64x32xf32>, vector<32x32xf32>, vector<64x32xf32> -> vector<64x32xf32>
    %c0_9 = arith.constant 0 : index
    %c0_10 = arith.constant 0 : index
    %10 = vector.load %arg5[%c0_9, %c0_10] : memref<1x32xf32, #tpu.memory_space<vmem>>, vector<1x32xf32>
    %11 = vector.broadcast %10 : vector<1x32xf32> to vector<64x32xf32>
    %12 = arith.addf %9, %11 : vector<64x32xf32>
    %cst_11 = arith.constant 0.000000e+00 : f32
    %13 = vector.broadcast %cst_11 : f32 to vector<64x32xf32>
    %14 = arith.maximumf %12, %13 : vector<64x32xf32>
    %c0_12 = arith.constant 0 : index
    %c0_13 = arith.constant 0 : index
    %15 = vector.load %arg6[%c0_12, %c0_13] : memref<32x32xf32, #tpu.memory_space<vmem>>, vector<32x32xf32>
    %cst_14 = arith.constant dense<0.000000e+00> : vector<64x32xf32>
    %16 = tpu.matmul %14, %15, %cst_14 {dimension_numbers = #tpu.dot_dimension_numbers<[1], [0], [0], [1], [0, 0, 1, 1], [], []>} : vector<64x32xf32>, vector<32x32xf32>, vector<64x32xf32> -> vector<64x32xf32>
    %c0_15 = arith.constant 0 : index
    %c0_16 = arith.constant 0 : index
    %17 = vector.load %arg7[%c0_15, %c0_16] : memref<1x32xf32, #tpu.memory_space<vmem>>, vector<1x32xf32>
    %18 = vector.broadcast %17 : vector<1x32xf32> to vector<64x32xf32>
    %19 = arith.addf %16, %18 : vector<64x32xf32>
    %cst_17 = arith.constant 0.000000e+00 : f32
    %20 = vector.broadcast %cst_17 : f32 to vector<64x32xf32>
    %21 = arith.maximumf %19, %20 : vector<64x32xf32>
    %c0_18 = arith.constant 0 : index
    %c0_19 = arith.constant 0 : index
    %22 = vector.load %arg8[%c0_18, %c0_19] : memref<32x32xf32, #tpu.memory_space<vmem>>, vector<32x32xf32>
    %cst_20 = arith.constant dense<0.000000e+00> : vector<64x32xf32>
    %23 = tpu.matmul %21, %22, %cst_20 {dimension_numbers = #tpu.dot_dimension_numbers<[1], [0], [0], [1], [0, 0, 1, 1], [], []>} : vector<64x32xf32>, vector<32x32xf32>, vector<64x32xf32> -> vector<64x32xf32>
    %c0_21 = arith.constant 0 : index
    %c0_22 = arith.constant 0 : index
    %24 = vector.load %arg9[%c0_21, %c0_22] : memref<1x32xf32, #tpu.memory_space<vmem>>, vector<1x32xf32>
    %25 = vector.broadcast %24 : vector<1x32xf32> to vector<64x32xf32>
    %26 = arith.addf %23, %25 : vector<64x32xf32>
    %cst_23 = arith.constant 0.000000e+00 : f32
    %27 = vector.broadcast %cst_23 : f32 to vector<64x32xf32>
    %28 = arith.maximumf %26, %27 : vector<64x32xf32>
    %c0_24 = arith.constant 0 : index
    %c0_25 = arith.constant 0 : index
    %29 = vector.load %arg10[%c0_24, %c0_25] : memref<32x128xf32, #tpu.memory_space<vmem>>, vector<32x128xf32>
    %cst_26 = arith.constant dense<0.000000e+00> : vector<64x128xf32>
    %30 = tpu.matmul %28, %29, %cst_26 {dimension_numbers = #tpu.dot_dimension_numbers<[1], [0], [0], [1], [0, 0, 1, 1], [], []>} : vector<64x32xf32>, vector<32x128xf32>, vector<64x128xf32> -> vector<64x128xf32>
    %c0_27 = arith.constant 0 : index
    %c0_28 = arith.constant 0 : index
    %31 = vector.load %arg11[%c0_27, %c0_28] : memref<1x128xf32, #tpu.memory_space<vmem>>, vector<1x128xf32>
    %32 = vector.broadcast %31 : vector<1x128xf32> to vector<64x128xf32>
    %33 = arith.addf %30, %32 : vector<64x128xf32>
    %c0_29 = arith.constant 0 : index
    %c0_30 = arith.constant 0 : index
    %34 = vector.load %arg12[%c0_29, %c0_30] : memref<64x128xf32, #tpu.memory_space<vmem>>, vector<64x128xf32>
    tpu.vector_store %arg12[%c0_29, %c0_30], %33 {strides = array<i32>} : memref<64x128xf32, #tpu.memory_space<vmem>>, vector<64x128xf32>,
    return
  }
  func.func @transform_0(%arg0: i32) -> (i32, i32) {
    %c0_i32 = arith.constant 0 : i32
    %c0_i32_0 = arith.constant 0 : i32
    return %arg0, %c0_i32 : i32, i32
  }
  func.func @transform_1(%arg0: i32) -> (i32, i32) {
    %c0_i32 = arith.constant 0 : i32
    %c0_i32_0 = arith.constant 0 : i32
    %c0_i32_1 = arith.constant 0 : i32
    return %c0_i32, %c0_i32_0 : i32, i32
  }
  func.func @transform_2(%arg0: i32) -> (i32, i32) {
    %c0_i32 = arith.constant 0 : i32
    %c0_i32_0 = arith.constant 0 : i32
    %c0_i32_1 = arith.constant 0 : i32
    return %c0_i32, %c0_i32_0 : i32, i32
  }
  func.func @transform_3(%arg0: i32) -> (i32, i32) {
    %c0_i32 = arith.constant 0 : i32
    %c0_i32_0 = arith.constant 0 : i32
    %c0_i32_1 = arith.constant 0 : i32
    return %c0_i32, %c0_i32_0 : i32, i32
  }
  func.func @transform_4(%arg0: i32) -> (i32, i32) {
    %c0_i32 = arith.constant 0 : i32
    %c0_i32_0 = arith.constant 0 : i32
    %c0_i32_1 = arith.constant 0 : i32
    return %c0_i32, %c0_i32_0 : i32, i32
  }
  func.func @transform_5(%arg0: i32) -> (i32, i32) {
    %c0_i32 = arith.constant 0 : i32
    %c0_i32_0 = arith.constant 0 : i32
    %c0_i32_1 = arith.constant 0 : i32
    return %c0_i32, %c0_i32_0 : i32, i32
  }
  func.func @transform_6(%arg0: i32) -> (i32, i32) {
    %c0_i32 = arith.constant 0 : i32
    %c0_i32_0 = arith.constant 0 : i32
    %c0_i32_1 = arith.constant 0 : i32
    return %c0_i32, %c0_i32_0 : i32, i32
  }
  func.func @transform_7(%arg0: i32) -> (i32, i32) {
    %c0_i32 = arith.constant 0 : i32
    %c0_i32_0 = arith.constant 0 : i32
    %c0_i32_1 = arith.constant 0 : i32
    return %c0_i32, %c0_i32_0 : i32, i32
  }
  func.func @transform_8(%arg0: i32) -> (i32, i32) {
    %c0_i32 = arith.constant 0 : i32
    %c0_i32_0 = arith.constant 0 : i32
    %c0_i32_1 = arith.constant 0 : i32
    return %c0_i32, %c0_i32_0 : i32, i32
  }
  func.func @transform_9(%arg0: i32) -> (i32, i32) {
    %c0_i32 = arith.constant 0 : i32
    %c0_i32_0 = arith.constant 0 : i32
    %c0_i32_1 = arith.constant 0 : i32
    return %c0_i32, %c0_i32_0 : i32, i32
  }
  func.func @transform_10(%arg0: i32) -> (i32, i32) {
    %c0_i32 = arith.constant 0 : i32
    %c0_i32_0 = arith.constant 0 : i32
    %c0_i32_1 = arith.constant 0 : i32
    return %c0_i32, %c0_i32_0 : i32, i32
  }
  func.func @transform_11(%arg0: i32) -> (i32, i32) {
    %c0_i32 = arith.constant 0 : i32
    %c0_i32_0 = arith.constant 0 : i32
    return %arg0, %c0_i32 : i32, i32
  }
}

</mosaic_0001>

<bundles_post_ra>
// kernel: toy_model_forward.1
= control target key start
LH: loop header
LB: loop body
LE: loop exit
PB: predicated region body
PF: predicated region fallthrough
CT: control target
= control target key end

     0   :  { %16 = vsyncpa [#allocation3], 0  ;;  %s1400_s0 = inlined_call_operand.vmem [shape: f32[64,32], index: 0, kind: input, shape index: {}]   ;;  %s1401_s1 = inlined_call_operand.vmem [shape: f32[32,32], index: 1, kind: input, shape index: {}]   ;;  %s1402_s2 = inlined_call_operand.vmem [shape: f32[1,32], index: 2, kind: input, shape index: {}]   ;;  %s1403_s3 = inlined_call_operand.vmem [shape: f32[32,32], index: 3, kind: input, shape index: {}]   ;;  %s1404_s4 = inlined_call_operand.vmem [shape: f32[1,32], index: 4, kind: input, shape index: {}]   ;;  %s1405_s5 = inlined_call_operand.vmem [shape: f32[32,32], index: 5, kind: input, shape index: {}]   ;;  %s1406_s6 = inlined_call_operand.hbm [shape: f32[1,32], index: 6, kind: input, shape index: {}]   ;;  %s1407_s7 = inlined_call_operand.hbm [shape: f32[32,32], index: 7, kind: input, shape index: {}]   ;;  %s1408_s8 = inlined_call_operand.hbm [shape: f32[1,32], index: 8, kind: input, shape index: {}]   ;;  %s1409_s9 = inlined_call_operand.vmem [shape: f32[32,128], index: 9, kind: input, shape index: {}]   ;;  %s1410_s10 = inlined_call_operand.vmem [shape: f32[1,128], index: 10, kind: input, shape index: {}]   ;;  %s1411_s11 = inlined_call_operand.vmem [shape: f32[64,128], index: 11, kind: output, shape index: {}]  }
   0x1   :  { %17 = vsyncpa [#allocation5], 0  ;;  %s1154_s17 = smov [#allocation4]   ;;  %s1084_s21 = scalar_lea.hbm %s1407_s7, 512 }
   0x2   :  { %s45_s18 = sshll.u32 %s1154_s17, 4  ;;  %p1085_p0 = scmp.ne.s32.totalorder %s1407_s7, %s1084_s21  ;;  %s46_s18 = int_to_ptr.vmem [resolvable:$true] %s45_s18 }
   0x3   :  { %p1088_p1 = scmp.lt.u32.totalorder %s1084_s21, %s1407_s7 }
   0x5   :  { %p1090_p2 = pnand %p1088_p1, %p1085_p0 }
   0x7   :  { %1093 = shalt.err (!%p1090_p2)
}
   0x8   :  { %s1094_s26 = scalar_lea.vmem %s46_s18, 512  ;;  %p1099_p4 = scmp.lt.s32.totalorder %s46_s18, %s46_s18 }
   0x9   :  { %p1095_p3 = scmp.ne.s32.totalorder %s46_s18, %s1094_s26  ;;  %p1100_p5 = scmp.lt.s32.totalorder %s1094_s26, %s1094_s26 }
   0xb   :  { %p1101_p6 = por %p1100_p5, %p1099_p4 }
   0xd   :  { %p1102_p7 = pnand %p1101_p6, %p1095_p3 }
   0xf   :  { %1105 = shalt.err (!%p1102_p7)
}
  0x10   :  { %s1155_s27 = smov 128   ;;  %s1156_s28 = smov 8  }
  0x11   :  { %51 = dma.hbm_to_vmem [thread:$0]  %s1407_s7, 512, %s46_s18, [#allocation5], %s1155_s27, %s1155_s27, %s1156_s28  }
  0x12   :  { %s1157_s12 = smov [#allocation2]   ;;  %s1158_s14 = smov [#allocation6]  }
  0x13   :  { %s36_s13 = sshll.u32 %s1157_s12, 4  ;;  %s58_s15 = sshll.u32 %s1158_s14, 4  ;;  %s37_s13 = int_to_ptr.vmem [resolvable:$true] %s36_s13  ;;  %s59_s15 = int_to_ptr.vmem [resolvable:$true] %s58_s15 }
  0x14   :  { %s1106_s19 = scalar_lea.hbm %s1406_s6, 16 }
  0x15   :  { %p1107_p8 = scmp.ne.s32.totalorder %s1406_s6, %s1106_s19  ;;  %p1110_p9 = scmp.lt.u32.totalorder %s1106_s19, %s1406_s6 }
  0x17   :  { %p1112_p10 = pnand %p1110_p9, %p1107_p8 }
  0x19   :  { %1115 = shalt.err (!%p1112_p10)
}
  0x1a   :  { %s1116_s7 = scalar_lea.vmem %s37_s13, 16  ;;  %s1120_s18 = scalar_lea.vmem %s37_s13, 32 }
  0x1b   :  { %p1117_p11 = scmp.ne.s32.totalorder %s37_s13, %s1116_s7  ;;  %p1121_p12 = scmp.lt.s32.totalorder %s37_s13, %s37_s13 }
  0x1c   :  { %p1122_p13 = scmp.lt.s32.totalorder %s1120_s18, %s1116_s7 }
  0x1e   :  { %p1123_p0 = por %p1122_p13, %p1121_p12 }
  0x20   :  { %p1124_p1 = pnand %p1123_p0, %p1117_p11 }
  0x22   :  { %1127 = shalt.err (!%p1124_p1)
}
  0x23   :  { %39 = dma.hbm_to_vmem [thread:$0]  %s1406_s6, 16, %s37_s13, [#allocation3]  }
  0x24   :  { %s1128_s28 = scalar_lea.hbm %s1408_s8, 16 }
  0x25   :  { %p1129_p2 = scmp.ne.s32.totalorder %s1408_s8, %s1128_s28  ;;  %p1132_p3 = scmp.lt.u32.totalorder %s1128_s28, %s1408_s8 }
  0x27   :  { %p1134_p4 = pnand %p1132_p3, %p1129_p2 }
  0x29   :  { %1137 = shalt.err (!%p1134_p4)
}
  0x2a   :  { %s1138_s16 = scalar_lea.vmem %s59_s15, 16  ;;  %s1142_s17 = scalar_lea.vmem %s59_s15, 32 }
  0x2b   :  { %p1139_p5 = scmp.ne.s32.totalorder %s59_s15, %s1138_s16  ;;  %p1143_p6 = scmp.lt.s32.totalorder %s59_s15, %s59_s15 }
  0x2c   :  { %p1144_p7 = scmp.lt.s32.totalorder %s1142_s17, %s1138_s16 }
  0x2e   :  { %p1145_p8 = por %p1144_p7, %p1143_p6 }
  0x30   :  { %p1146_p9 = pnand %p1145_p8, %p1139_p5 }
  0x32   :  { %1149 = shalt.err (!%p1146_p9)
}
  0x33   :  { %61 = dma.hbm_to_vmem [thread:$0]  %s1408_s8, 16, %s59_s15, [#allocation5]  }
  0x34   :  { %1150 = dma.done.wait [#allocation3], 16  }
  0x35   :  { %1151 = vsyncadd [#allocation3], 4294967280 }
  0x36   :  { %1152 = dma.done.wait [#allocation5], 528  }
  0x37   :  { %1153 = vsyncadd [#allocation5], 4294966768  ;;  %vm94_vm0 = vcmask 261120   ;;  %v83_v0 = vld [vmem:[%s1401_s1] sm:$0xff]  ;;  %v84_v1 = vld [vmem:[%s1401_s1 + $0x8] sm:$0xff] }
  0x38   :  { %v85_v2 = vld [vmem:[%s1401_s1 + $0x10] sm:$0xff]  ;;  %v1035_v3 = vpack.c.bf16 %v84_v1, %v83_v0  ;;  %v86_v4 = vld [vmem:[%s1401_s1 + $0x18] sm:$0xff]  ;;  %v75_v5 = vld [vmem:[%s1400_s0] sm:$0xff] }
  0x39   :  { %v1039_v6 = vpack.c.bf16 %v86_v4, %v85_v2  ;;  %943 = vmatprep.mubr.msk.f32.mxu0 %vm94_vm0, %v75_v5  ;;  %v79_v7 = vld [vmem:[%s1400_s0 + $0x20] sm:$0xff]  ;;  %v233_v9 = vld [vmem:[%s1403_s3 + $0x8] sm:$0xff]  ;;  %v77_v13 = vld [vmem:[%s1400_s0 + $0x10] sm:$0xff] }
  0x3a   :  { %1036 = vmatprep.subr.bf16.mxu0 %v1035_v3  ;;  %1075 = vmatprep.subr.bf16.mxu1 %v1035_v3  ;;  %v232_v8 = vld [vmem:[%s1403_s3] sm:$0xff]  ;;  %v76_v11 = vld [vmem:[%s1400_s0 + $0x8] sm:$0xff]  ;;  %v81_v14 = vld [vmem:[%s1400_s0 + $0x30] sm:$0xff] }
  0x3b   :  { %1038 = vmatpush3.bf16.msra.mxu0 %v1035_v3  ;;  %1077 = vmatpush3.bf16.msra.mxu1 %v1035_v3  ;;  %v1043_v10 = vpack.c.bf16 %v233_v9, %v232_v8  ;;  %v80_v12 = vld [vmem:[%s1400_s0 + $0x28] sm:$0xff]  ;;  %v78_v15 = vld [vmem:[%s1400_s0 + $0x18] sm:$0xff]  ;;  %v234_v17 = vld [vmem:[%s1403_s3 + $0x10] sm:$0xff] }
  0x3c   :  { %1040 = vmatprep.subr.bf16.mxu0 %v1039_v6  ;;  %1076 = vmatprep.subr.bf16.mxu1 %v1039_v6  ;;  %v82_v16 = vld [vmem:[%s1400_s0 + $0x38] sm:$0xff]  ;;  %v380_v20 = vld [vmem:[%s1405_s5] sm:$0xff]  ;;  %v381_v21 = vld [vmem:[%s1405_s5 + $0x8] sm:$0xff] }
  0x3d   :  { %949 = vmatprep.mubr.msk.f32.mxu1 %vm94_vm0, %v79_v7  ;;  %v235_v18 = vld [vmem:[%s1403_s3 + $0x18] sm:$0xff]  ;;  %v1051_v22 = vpack.c.bf16 %v381_v21, %v380_v20  ;;  %v830_v23 = vld [vmem:[%s1402_s2] ss:$0 sm:$0xff]  ;;  %v382_v48 = vld [vmem:[%s1405_s5 + $0x10] sm:$0xff] }
  0x3e   :  { %v1047_v19 = vpack.c.bf16 %v235_v18, %v234_v17  ;;  %v383_v49 = vld [vmem:[%s1405_s5 + $0x18] sm:$0xff]  ;;  %v528_v51 = vld [vmem:[#allocation4] sm:$0xff]  ;;  %v529_v52 = vld [vmem:[#allocation4 + $0x8] sm:$0xff] }
  0x3f   :  { %1042 = vmatpush3.bf16.msra.mxu0 %v1039_v6  ;;  %1078 = vmatpush3.bf16.msra.mxu1 %v1039_v6  ;;  %v1055_v50 = vpack.c.bf16 %v383_v49, %v382_v48  ;;  %v530_v53 = vld [vmem:[#allocation4 + $0x10] sm:$0xff]  ;;  %v1059_v54 = vpack.c.bf16 %v529_v52, %v528_v51  ;;  %v531_v55 = vld [vmem:[#allocation4 + $0x18] sm:$0xff]  ;;  %v857_v49 = vld [vmem:[#allocation6] ss:$0 sm:$0xff] }
  0x40   :  { %1044 = vmatprep.subr.bf16.mxu1 %v1043_v10  ;;  %1052 = vmatprep.subr.bf16.mxu0 %v1051_v22  ;;  %v1063_v56 = vpack.c.bf16 %v531_v55, %v530_v53  ;;  %v839_v57 = vld [vmem:[%s1404_s4] ss:$0 sm:$0xff]  ;;  %v678_v20 = vld [vmem:[%s1409_s9 + $0x10] sm:$0xff] }
  0x41   :  { %v676_v18 = vld [vmem:[%s1409_s9] sm:$0xff] }
  0x42   :  { %944 = vmatmul.mubr.msk.f32.vlgmr.msra.gmra.mrb[0].mxu0 %vm94_vm0, %v76_v11  ;;  %950 = vmatmul.mubr.msk.f32.vlgmr.msra.gmra.mrb[0].mxu1 %vm94_vm0, %v80_v12 }
  0x43   :  { %946 = vmatprep.mubr.msk.f32.mxu0 %vm94_vm0, %v77_v13  ;;  %952 = vmatprep.mubr.msk.f32.mxu1 %vm94_vm0, %v81_v14 }
  0x44   :  { %1046 = vmatpush3.bf16.msra.mxu1 %v1043_v10  ;;  %1054 = vmatpush3.bf16.msra.mxu0 %v1051_v22  ;;  %v679_v22 = vld [vmem:[%s1409_s9 + $0x18] sm:$0xff] }
  0x45   :  { %1048 = vmatprep.subr.bf16.mxu1 %v1047_v19  ;;  %1056 = vmatprep.subr.bf16.mxu0 %v1055_v50 }
  0x46   :  { %947 = vmatmul.mubr.msk.f32.gmra.mrb[2].mxu0 %vm94_vm0, %v78_v15  ;;  %953 = vmatmul.mubr.msk.f32.gmra.mrb[2].mxu1 %vm94_vm0, %v82_v16 }
  0x48   :  { %1050 = vmatpush3.bf16.msra.mxu1 %v1047_v19  ;;  %1058 = vmatpush3.bf16.msra.mxu0 %v1055_v50  ;;  %v677_v19 = vld [vmem:[%s1409_s9 + $0x8] sm:$0xff] }
  0x49   :  { %1060 = vmatprep.subr.bf16.mxu1 %v1059_v54  ;;  %v1067_v21 = vpack.c.bf16 %v677_v19, %v676_v18 }
  0x4b   :  { %1068 = vmatprep.subr.bf16.mxu0 %v1067_v21 }
 0x115   :  { %v945_v24 = vpop.f32.mrb[0].mxu0  ;;  %v951_v25 = vpop.f32.mrb[0].mxu1 }
 0x116   :  { %v191_v26 = vadd.f32 %v945_v24, %v830_v23  ;;  %v185_v27 = vpop.f32.mrb[1].mxu0  ;;  %v205_v28 = vpop.f32.mrb[1].mxu1  ;;  %v211_v43 = vadd.f32 %v951_v25, %v830_v23  ;;  %v848_v24 = vld [vmem:[#allocation2] ss:$0 sm:$0xff] }
 0x117   :  { %v186_v29 = vadd.f32 %v830_v23, %v185_v27  ;;  %v206_v32 = vadd.f32 %v830_v23, %v205_v28 }
 0x118   :  { %v225_v34 = vmax.f32 %v191_v26, 0.0  ;;  %v229_v45 = vmax.f32 %v211_v43, 0.0 }
 0x119   :  { %v224_v30 = vmax.f32 %v186_v29, 0.0  ;;  %v948_v31 = vpop.f32.mrb[2].mxu0  ;;  %v954_v33 = vpop.f32.mrb[2].mxu1  ;;  %v228_v40 = vmax.f32 %v206_v32, 0.0 }
 0x11a   :  { %v201_v35 = vadd.f32 %v948_v31, %v830_v23  ;;  %v195_v36 = vpop.f32.mrb[3].mxu0  ;;  %v215_v37 = vpop.f32.mrb[3].mxu1  ;;  %v221_v46 = vadd.f32 %v954_v33, %v830_v23 }
 0x11b   :  { %v196_v38 = vadd.f32 %v830_v23, %v195_v36  ;;  %963 = vmatprep.mubr.msk.f32.mxu1 %vm94_vm0, %v224_v30  ;;  %v216_v41 = vadd.f32 %v830_v23, %v215_v37  ;;  %v1071_v23 = vpack.c.bf16 %v679_v22, %v678_v20 }
 0x11c   :  { %964 = vmatmul.mubr.msk.f32.vlgmr.msra.gmra.mrb[4].mxu1 %vm94_vm0, %v225_v34  ;;  %v227_v42 = vmax.f32 %v201_v35, 0.0  ;;  %v231_v47 = vmax.f32 %v221_v46, 0.0 }
 0x11d   :  { %v226_v39 = vmax.f32 %v196_v38, 0.0  ;;  %v230_v44 = vmax.f32 %v216_v41, 0.0  ;;  %1062 = vmatpush3.bf16.msra.mxu1 %v1059_v54 }
 0x11e   :  { %1064 = vmatprep.subr.bf16.mxu1 %v1063_v56 }
 0x11f   :  { %966 = vmatprep.mubr.msk.f32.mxu1 %vm94_vm0, %v226_v39 }
 0x120   :  { %967 = vmatmul.mubr.msk.f32.gmra.mrb[6].mxu1 %vm94_vm0, %v227_v42 }
 0x121   :  { %969 = vmatprep.mubr.msk.f32.mxu1 %vm94_vm0, %v228_v40  ;;  %1066 = vmatpush3.bf16.msra.mxu1 %v1063_v56 }
 0x124   :  { %970 = vmatmul.mubr.msk.f32.gmra.mrb[8].mxu1 %vm94_vm0, %v229_v45 }
 0x125   :  { %972 = vmatprep.mubr.msk.f32.mxu1 %vm94_vm0, %v230_v44 }
 0x128   :  { %973 = vmatmul.mubr.msk.f32.gmra.mrb[10].mxu1 %vm94_vm0, %v231_v47 }
 0x1ef   :  { %v965_v58 = vpop.f32.mrb[4].mxu1 }
 0x1f0   :  { %v339_v59 = vadd.f32 %v965_v58, %v839_v57  ;;  %v333_v60 = vpop.f32.mrb[5].mxu1 }
 0x1f1   :  { %v334_v61 = vadd.f32 %v839_v57, %v333_v60 }
 0x1f2   :  { %v373_v0 = vmax.f32 %v339_v59, 0.0 }
 0x1f3   :  { %v372_v62 = vmax.f32 %v334_v61, 0.0  ;;  %v968_v63 = vpop.f32.mrb[6].mxu1 }
 0x1f4   :  { %v349_v1 = vadd.f32 %v968_v63, %v839_v57  ;;  %v343_v2 = vpop.f32.mrb[7].mxu1 }
 0x1f5   :  { %v344_v3 = vadd.f32 %v839_v57, %v343_v2  ;;  %983 = vmatprep.mubr.msk.f32.mxu0 %vm94_vm0, %v372_v62 }
 0x1f6   :  { %984 = vmatmul.mubr.msk.f32.vlgmr.msra.gmra.mrb[4].mxu0 %vm94_vm0, %v373_v0  ;;  %v375_v6 = vmax.f32 %v349_v1, 0.0 }
 0x1f7   :  { %v374_v4 = vmax.f32 %v344_v3, 0.0  ;;  %v971_v5 = vpop.f32.mrb[8].mxu1  ;;  %1070 = vmatpush3.bf16.msra.mxu0 %v1067_v21 }
 0x1f8   :  { %v359_v7 = vadd.f32 %v971_v5, %v839_v57  ;;  %v353_v8 = vpop.f32.mrb[9].mxu1  ;;  %1072 = vmatprep.subr.bf16.mxu0 %v1071_v23 }
 0x1f9   :  { %v354_v9 = vadd.f32 %v839_v57, %v353_v8  ;;  %986 = vmatprep.mubr.msk.f32.mxu0 %vm94_vm0, %v374_v4 }
 0x1fa   :  { %987 = vmatmul.mubr.msk.f32.gmra.mrb[6].mxu0 %vm94_vm0, %v375_v6  ;;  %v377_v12 = vmax.f32 %v359_v7, 0.0 }
 0x1fb   :  { %v376_v10 = vmax.f32 %v354_v9, 0.0  ;;  %v974_v11 = vpop.f32.mrb[10].mxu1  ;;  %1074 = vmatpush3.bf16.msra.mxu0 %v1071_v23 }
 0x1fc   :  { %v369_v13 = vadd.f32 %v974_v11, %v839_v57  ;;  %v363_v14 = vpop.f32.mrb[11].mxu1 }
 0x1fd   :  { %v364_v15 = vadd.f32 %v839_v57, %v363_v14  ;;  %989 = vmatprep.mubr.msk.f32.mxu0 %vm94_vm0, %v376_v10  ;;  %v866_v10 = vld [vmem:[%s1410_s10] ss:$0 sm:$0xff] }
 0x1fe   :  { %990 = vmatmul.mubr.msk.f32.gmra.mrb[8].mxu0 %vm94_vm0, %v377_v12  ;;  %v379_v17 = vmax.f32 %v369_v13, 0.0 }
 0x1ff   :  { %v378_v16 = vmax.f32 %v364_v15, 0.0 }
 0x201   :  { %992 = vmatprep.mubr.msk.f32.mxu0 %vm94_vm0, %v378_v16 }
 0x202   :  { %993 = vmatmul.mubr.msk.f32.gmra.mrb[10].mxu0 %vm94_vm0, %v379_v17 }
 0x2c9   :  { %v985_v25 = vpop.f32.mrb[4].mxu0 }
 0x2ca   :  { %v487_v26 = vadd.f32 %v985_v25, %v848_v24  ;;  %v481_v27 = vpop.f32.mrb[5].mxu0 }
 0x2cb   :  { %v482_v28 = vadd.f32 %v848_v24, %v481_v27 }
 0x2cc   :  { %v521_v31 = vmax.f32 %v487_v26, 0.0 }
 0x2cd   :  { %v520_v29 = vmax.f32 %v482_v28, 0.0  ;;  %v988_v30 = vpop.f32.mrb[6].mxu0 }
 0x2ce   :  { %v497_v32 = vadd.f32 %v988_v30, %v848_v24  ;;  %v491_v33 = vpop.f32.mrb[7].mxu0 }
 0x2cf   :  { %v492_v34 = vadd.f32 %v848_v24, %v491_v33  ;;  %1003 = vmatprep.mubr.msk.f32.mxu1 %vm94_vm0, %v520_v29 }
 0x2d0   :  { %1004 = vmatmul.mubr.msk.f32.vlgmr.msra.gmra.mrb[12].mxu1 %vm94_vm0, %v521_v31  ;;  %v523_v37 = vmax.f32 %v497_v32, 0.0 }
 0x2d1   :  { %v522_v35 = vmax.f32 %v492_v34, 0.0  ;;  %v991_v36 = vpop.f32.mrb[8].mxu0 }
 0x2d2   :  { %v507_v38 = vadd.f32 %v991_v36, %v848_v24  ;;  %v501_v39 = vpop.f32.mrb[9].mxu0 }
 0x2d3   :  { %v502_v40 = vadd.f32 %v848_v24, %v501_v39  ;;  %1006 = vmatprep.mubr.msk.f32.mxu1 %vm94_vm0, %v522_v35 }
 0x2d4   :  { %1007 = vmatmul.mubr.msk.f32.gmra.mrb[14].mxu1 %vm94_vm0, %v523_v37  ;;  %v525_v43 = vmax.f32 %v507_v38, 0.0 }
 0x2d5   :  { %v524_v41 = vmax.f32 %v502_v40, 0.0  ;;  %v994_v42 = vpop.f32.mrb[10].mxu0 }
 0x2d6   :  { %v517_v44 = vadd.f32 %v994_v42, %v848_v24  ;;  %v511_v45 = vpop.f32.mrb[11].mxu0 }
 0x2d7   :  { %v512_v46 = vadd.f32 %v848_v24, %v511_v45  ;;  %1009 = vmatprep.mubr.msk.f32.mxu1 %vm94_vm0, %v524_v41 }
 0x2d8   :  { %1010 = vmatmul.mubr.msk.f32.gmra.mrb[16].mxu1 %vm94_vm0, %v525_v43  ;;  %v527_v48 = vmax.f32 %v517_v44, 0.0 }
 0x2d9   :  { %v526_v47 = vmax.f32 %v512_v46, 0.0 }
 0x2db   :  { %1012 = vmatprep.mubr.msk.f32.mxu1 %vm94_vm0, %v526_v47 }
 0x2dc   :  { %1013 = vmatmul.mubr.msk.f32.gmra.mrb[18].mxu1 %vm94_vm0, %v527_v48 }
 0x3a3   :  { %v1005_v50 = vpop.f32.mrb[12].mxu1 }
 0x3a4   :  { %v635_v51 = vadd.f32 %v1005_v50, %v857_v49  ;;  %v629_v52 = vpop.f32.mrb[13].mxu1 }
 0x3a5   :  { %v630_v53 = vadd.f32 %v857_v49, %v629_v52 }
 0x3a6   :  { %v669_v56 = vmax.f32 %v635_v51, 0.0 }
 0x3a7   :  { %v668_v54 = vmax.f32 %v630_v53, 0.0  ;;  %v1008_v55 = vpop.f32.mrb[14].mxu1 }
 0x3a8   :  { %v645_v57 = vadd.f32 %v1008_v55, %v857_v49  ;;  %v639_v58 = vpop.f32.mrb[15].mxu1 }
 0x3a9   :  { %v640_v59 = vadd.f32 %v857_v49, %v639_v58  ;;  %1023 = vmatprep.mubr.msk.f32.mxu0 %vm94_vm0, %v668_v54 }
 0x3aa   :  { %1024 = vmatmul.mubr.msk.f32.vlgmr.msra.gmra.mrb[12].mxu0 %vm94_vm0, %v669_v56  ;;  %v671_v62 = vmax.f32 %v645_v57, 0.0 }
 0x3ab   :  { %v670_v60 = vmax.f32 %v640_v59, 0.0  ;;  %v1011_v61 = vpop.f32.mrb[16].mxu1 }
 0x3ac   :  { %v655_v63 = vadd.f32 %v1011_v61, %v857_v49  ;;  %v649_v0 = vpop.f32.mrb[17].mxu1 }
 0x3ad   :  { %v650_v1 = vadd.f32 %v857_v49, %v649_v0  ;;  %1026 = vmatprep.mubr.msk.f32.mxu0 %vm94_vm0, %v670_v60 }
 0x3ae   :  { %1027 = vmatmul.mubr.msk.f32.gmra.mrb[14].mxu0 %vm94_vm0, %v671_v62  ;;  %v673_v4 = vmax.f32 %v655_v63, 0.0 }
 0x3af   :  { %v672_v2 = vmax.f32 %v650_v1, 0.0  ;;  %v1014_v3 = vpop.f32.mrb[18].mxu1 }
 0x3b0   :  { %v665_v5 = vadd.f32 %v1014_v3, %v857_v49  ;;  %v659_v6 = vpop.f32.mrb[19].mxu1 }
 0x3b1   :  { %v660_v7 = vadd.f32 %v857_v49, %v659_v6  ;;  %1029 = vmatprep.mubr.msk.f32.mxu0 %vm94_vm0, %v672_v2 }
 0x3b2   :  { %1030 = vmatmul.mubr.msk.f32.gmra.mrb[16].mxu0 %vm94_vm0, %v673_v4  ;;  %v675_v9 = vmax.f32 %v665_v5, 0.0 }
 0x3b3   :  { %v674_v8 = vmax.f32 %v660_v7, 0.0 }
 0x3b5   :  { %1032 = vmatprep.mubr.msk.f32.mxu0 %vm94_vm0, %v674_v8 }
 0x3b6   :  { %1033 = vmatmul.mubr.msk.f32.gmra.mrb[18].mxu0 %vm94_vm0, %v675_v9 }
 0x47d   :  { %v1025_v11 = vpop.f32.mrb[12].mxu0 }
 0x47e   :  { %v783_v12 = vadd.f32 %v1025_v11, %v866_v10  ;;  %v777_v13 = vpop.f32.mrb[13].mxu0 }
 0x47f   :  { %v778_v14 = vadd.f32 %v866_v10, %v777_v13 }
 0x480   :  { %817 = vst [vmem:[%s1411_s11 + $0x8] sm:$0xff] %v783_v12 }
 0x481   :  { %816 = vst [vmem:[%s1411_s11] sm:$0xff] %v778_v14  ;;  %v1028_v15 = vpop.f32.mrb[14].mxu0 }
 0x482   :  { %v793_v16 = vadd.f32 %v1028_v15, %v866_v10  ;;  %v787_v17 = vpop.f32.mrb[15].mxu0 }
 0x483   :  { %v788_v18 = vadd.f32 %v866_v10, %v787_v17 }
 0x484   :  { %819 = vst [vmem:[%s1411_s11 + $0x18] sm:$0xff] %v793_v16 }
 0x485   :  { %818 = vst [vmem:[%s1411_s11 + $0x10] sm:$0xff] %v788_v18  ;;  %v1031_v19 = vpop.f32.mrb[16].mxu0 }
 0x486   :  { %v803_v20 = vadd.f32 %v1031_v19, %v866_v10  ;;  %v797_v21 = vpop.f32.mrb[17].mxu0 }
 0x487   :  { %v798_v22 = vadd.f32 %v866_v10, %v797_v21 }
 0x488   :  { %821 = vst [vmem:[%s1411_s11 + $0x28] sm:$0xff] %v803_v20 }
 0x489   :  { %820 = vst [vmem:[%s1411_s11 + $0x20] sm:$0xff] %v798_v22  ;;  %v1034_v23 = vpop.f32.mrb[18].mxu0 }
 0x48a   :  { %v813_v24 = vadd.f32 %v1034_v23, %v866_v10  ;;  %v807_v25 = vpop.f32.mrb[19].mxu0 }
 0x48b   :  { %v808_v26 = vadd.f32 %v866_v10, %v807_v25 }
 0x48c   :  { %823 = vst [vmem:[%s1411_s11 + $0x38] sm:$0xff] %v813_v24 }
 0x48d   :  { %822 = vst [vmem:[%s1411_s11 + $0x30] sm:$0xff] %v808_v26 }
 0x48e   :  { %828 = vsyncpa [#allocation3], 1 }
 0x48f   :  { %829 = vsyncpa [#allocation5], 1 }

// kernel: toy_model_forward.1
= control target key start
LH: loop header
LB: loop body
LE: loop exit
PB: predicated region body
PF: predicated region fallthrough
CT: control target
= control target key end

     0   :  { %16 = vsyncpa [#allocation3], 0  ;;  %s1400_s0 = inlined_call_operand.vmem [shape: f32[64,32], index: 0, kind: input, shape index: {}]   ;;  %s1401_s1 = inlined_call_operand.vmem [shape: f32[32,32], index: 1, kind: input, shape index: {}]   ;;  %s1402_s2 = inlined_call_operand.vmem [shape: f32[1,32], index: 2, kind: input, shape index: {}]   ;;  %s1403_s3 = inlined_call_operand.vmem [shape: f32[32,32], index: 3, kind: input, shape index: {}]   ;;  %s1404_s4 = inlined_call_operand.vmem [shape: f32[1,32], index: 4, kind: input, shape index: {}]   ;;  %s1405_s5 = inlined_call_operand.vmem [shape: f32[32,32], index: 5, kind: input, shape index: {}]   ;;  %s1406_s6 = inlined_call_operand.hbm [shape: f32[1,32], index: 6, kind: input, shape index: {}]   ;;  %s1407_s7 = inlined_call_operand.hbm [shape: f32[32,32], index: 7, kind: input, shape index: {}]   ;;  %s1408_s8 = inlined_call_operand.hbm [shape: f32[1,32], index: 8, kind: input, shape index: {}]   ;;  %s1409_s9 = inlined_call_operand.vmem [shape: f32[32,128], index: 9, kind: input, shape index: {}]   ;;  %s1410_s10 = inlined_call_operand.vmem [shape: f32[1,128], index: 10, kind: input, shape index: {}]   ;;  %s1411_s11 = inlined_call_operand.vmem [shape: f32[64,128], index: 11, kind: output, shape index: {}]  }
   0x1   :  { %17 = vsyncpa [#allocation5], 0  ;;  %s1154_s17 = smov [#allocation4]   ;;  %s1084_s21 = scalar_lea.hbm %s1407_s7, 512 }
   0x2   :  { %s45_s18 = sshll.u32 %s1154_s17, 4  ;;  %p1085_p0 = scmp.ne.s32.totalorder %s1407_s7, %s1084_s21  ;;  %s46_s18 = int_to_ptr.vmem [resolvable:$true] %s45_s18 }
   0x3   :  { %p1088_p1 = scmp.lt.u32.totalorder %s1084_s21, %s1407_s7 }
   0x5   :  { %p1090_p2 = pnand %p1088_p1, %p1085_p0 }
   0x7   :  { %1093 = shalt.err (!%p1090_p2)
}
   0x8   :  { %s1094_s26 = scalar_lea.vmem %s46_s18, 512  ;;  %p1099_p4 = scmp.lt.s32.totalorder %s46_s18, %s46_s18 }
   0x9   :  { %p1095_p3 = scmp.ne.s32.totalorder %s46_s18, %s1094_s26  ;;  %p1100_p5 = scmp.lt.s32.totalorder %s1094_s26, %s1094_s26 }
   0xb   :  { %p1101_p6 = por %p1100_p5, %p1099_p4 }
   0xd   :  { %p1102_p7 = pnand %p1101_p6, %p1095_p3 }
   0xf   :  { %1105 = shalt.err (!%p1102_p7)
}
  0x10   :  { %s1155_s27 = smov 128   ;;  %s1156_s28 = smov 8  }
  0x11   :  { %51 = dma.hbm_to_vmem [thread:$0]  %s1407_s7, 512, %s46_s18, [#allocation5], %s1155_s27, %s1155_s27, %s1156_s28  }
  0x12   :  { %s1157_s12 = smov [#allocation2]   ;;  %s1158_s14 = smov [#allocation6]  }
  0x13   :  { %s36_s13 = sshll.u32 %s1157_s12, 4  ;;  %s58_s15 = sshll.u32 %s1158_s14, 4  ;;  %s37_s13 = int_to_ptr.vmem [resolvable:$true] %s36_s13  ;;  %s59_s15 = int_to_ptr.vmem [resolvable:$true] %s58_s15 }
  0x14   :  { %s1106_s19 = scalar_lea.hbm %s1406_s6, 16 }
  0x15   :  { %p1107_p8 = scmp.ne.s32.totalorder %s1406_s6, %s1106_s19  ;;  %p1110_p9 = scmp.lt.u32.totalorder %s1106_s19, %s1406_s6 }
  0x17   :  { %p1112_p10 = pnand %p1110_p9, %p1107_p8 }
  0x19   :  { %1115 = shalt.err (!%p1112_p10)
}
  0x1a   :  { %s1116_s7 = scalar_lea.vmem %s37_s13, 16  ;;  %s1120_s18 = scalar_lea.vmem %s37_s13, 32 }
  0x1b   :  { %p1117_p11 = scmp.ne.s32.totalorder %s37_s13, %s1116_s7  ;;  %p1121_p12 = scmp.lt.s32.totalorder %s37_s13, %s37_s13 }
  0x1c   :  { %p1122_p13 = scmp.lt.s32.totalorder %s1120_s18, %s1116_s7 }
  0x1e   :  { %p1123_p0 = por %p1122_p13, %p1121_p12 }
  0x20   :  { %p1124_p1 = pnand %p1123_p0, %p1117_p11 }
  0x22   :  { %1127 = shalt.err (!%p1124_p1)
}
  0x23   :  { %39 = dma.hbm_to_vmem [thread:$0]  %s1406_s6, 16, %s37_s13, [#allocation3]  }
  0x24   :  { %s1128_s28 = scalar_lea.hbm %s1408_s8, 16 }
  0x25   :  { %p1129_p2 = scmp.ne.s32.totalorder %s1408_s8, %s1128_s28  ;;  %p1132_p3 = scmp.lt.u32.totalorder %s1128_s28, %s1408_s8 }
  0x27   :  { %p1134_p4 = pnand %p1132_p3, %p1129_p2 }
  0x29   :  { %1137 = shalt.err (!%p1134_p4)
}
  0x2a   :  { %s1138_s16 = scalar_lea.vmem %s59_s15, 16  ;;  %s1142_s17 = scalar_lea.vmem %s59_s15, 32 }
  0x2b   :  { %p1139_p5 = scmp.ne.s32.totalorder %s59_s15, %s1138_s16  ;;  %p1143_p6 = scmp.lt.s32.totalorder %s59_s15, %s59_s15 }
  0x2c   :  { %p1144_p7 = scmp.lt.s32.totalorder %s1142_s17, %s1138_s16 }
  0x2e   :  { %p1145_p8 = por %p1144_p7, %p1143_p6 }
  0x30   :  { %p1146_p9 = pnand %p1145_p8, %p1139_p5 }
  0x32   :  { %1149 = shalt.err (!%p1146_p9)
}
  0x33   :  { %61 = dma.hbm_to_vmem [thread:$0]  %s1408_s8, 16, %s59_s15, [#allocation5]  }
  0x34   :  { %1150 = dma.done.wait [#allocation3], 16  }
  0x35   :  { %1151 = vsyncadd [#allocation3], 4294967280 }
  0x36   :  { %1152 = dma.done.wait [#allocation5], 528  }
  0x37   :  { %1153 = vsyncadd [#allocation5], 4294966768  ;;  %vm94_vm0 = vcmask 261120   ;;  %v83_v0 = vld [vmem:[%s1401_s1] sm:$0xff]  ;;  %v84_v1 = vld [vmem:[%s1401_s1 + $0x8] sm:$0xff] }
  0x38   :  { %v85_v2 = vld [vmem:[%s1401_s1 + $0x10] sm:$0xff]  ;;  %v1035_v3 = vpack.c.bf16 %v84_v1, %v83_v0  ;;  %v86_v4 = vld [vmem:[%s1401_s1 + $0x18] sm:$0xff]  ;;  %v75_v5 = vld [vmem:[%s1400_s0] sm:$0xff] }
  0x39   :  { %v1039_v6 = vpack.c.bf16 %v86_v4, %v85_v2  ;;  %943 = vmatprep.mubr.msk.f32.mxu0 %vm94_vm0, %v75_v5  ;;  %v79_v7 = vld [vmem:[%s1400_s0 + $0x20] sm:$0xff]  ;;  %v233_v9 = vld [vmem:[%s1403_s3 + $0x8] sm:$0xff]  ;;  %v77_v13 = vld [vmem:[%s1400_s0 + $0x10] sm:$0xff] }
  0x3a   :  { %1036 = vmatprep.subr.bf16.mxu0 %v1035_v3  ;;  %1075 = vmatprep.subr.bf16.mxu1 %v1035_v3  ;;  %v232_v8 = vld [vmem:[%s1403_s3] sm:$0xff]  ;;  %v76_v11 = vld [vmem:[%s1400_s0 + $0x8] sm:$0xff]  ;;  %v81_v14 = vld [vmem:[%s1400_s0 + $0x30] sm:$0xff] }
  0x3b   :  { %1038 = vmatpush3.bf16.msra.mxu0 %v1035_v3  ;;  %1077 = vmatpush3.bf16.msra.mxu1 %v1035_v3  ;;  %v1043_v10 = vpack.c.bf16 %v233_v9, %v232_v8  ;;  %v80_v12 = vld [vmem:[%s1400_s0 + $0x28] sm:$0xff]  ;;  %v78_v15 = vld [vmem:[%s1400_s0 + $0x18] sm:$0xff]  ;;  %v234_v17 = vld [vmem:[%s1403_s3 + $0x10] sm:$0xff] }
  0x3c   :  { %1040 = vmatprep.subr.bf16.mxu0 %v1039_v6  ;;  %1076 = vmatprep.subr.bf16.mxu1 %v1039_v6  ;;  %v82_v16 = vld [vmem:[%s1400_s0 + $0x38] sm:$0xff]  ;;  %v380_v20 = vld [vmem:[%s1405_s5] sm:$0xff]  ;;  %v381_v21 = vld [vmem:[%s1405_s5 + $0x8] sm:$0xff] }
  0x3d   :  { %949 = vmatprep.mubr.msk.f32.mxu1 %vm94_vm0, %v79_v7  ;;  %v235_v18 = vld [vmem:[%s1403_s3 + $0x18] sm:$0xff]  ;;  %v1051_v22 = vpack.c.bf16 %v381_v21, %v380_v20  ;;  %v830_v23 = vld [vmem:[%s1402_s2] ss:$0 sm:$0xff]  ;;  %v382_v48 = vld [vmem:[%s1405_s5 + $0x10] sm:$0xff] }
  0x3e   :  { %v1047_v19 = vpack.c.bf16 %v235_v18, %v234_v17  ;;  %v383_v49 = vld [vmem:[%s1405_s5 + $0x18] sm:$0xff]  ;;  %v528_v51 = vld [vmem:[#allocation4] sm:$0xff]  ;;  %v529_v52 = vld [vmem:[#allocation4 + $0x8] sm:$0xff] }
  0x3f   :  { %1042 = vmatpush3.bf16.msra.mxu0 %v1039_v6  ;;  %1078 = vmatpush3.bf16.msra.mxu1 %v1039_v6  ;;  %v1055_v50 = vpack.c.bf16 %v383_v49, %v382_v48  ;;  %v530_v53 = vld [vmem:[#allocation4 + $0x10] sm:$0xff]  ;;  %v1059_v54 = vpack.c.bf16 %v529_v52, %v528_v51  ;;  %v531_v55 = vld [vmem:[#allocation4 + $0x18] sm:$0xff]  ;;  %v857_v49 = vld [vmem:[#allocation6] ss:$0 sm:$0xff] }
  0x40   :  { %1044 = vmatprep.subr.bf16.mxu1 %v1043_v10  ;;  %1052 = vmatprep.subr.bf16.mxu0 %v1051_v22  ;;  %v1063_v56 = vpack.c.bf16 %v531_v55, %v530_v53  ;;  %v839_v57 = vld [vmem:[%s1404_s4] ss:$0 sm:$0xff]  ;;  %v678_v20 = vld [vmem:[%s1409_s9 + $0x10] sm:$0xff] }
  0x41   :  { %v676_v18 = vld [vmem:[%s1409_s9] sm:$0xff] }
  0x42   :  { %944 = vmatmul.mubr.msk.f32.vlgmr.msra.gmra.mrb[0].mxu0 %vm94_vm0, %v76_v11  ;;  %950 = vmatmul.mubr.msk.f32.vlgmr.msra.gmra.mrb[0].mxu1 %vm94_vm0, %v80_v12 }
  0x43   :  { %946 = vmatprep.mubr.msk.f32.mxu0 %vm94_vm0, %v77_v13  ;;  %952 = vmatprep.mubr.msk.f32.mxu1 %vm94_vm0, %v81_v14 }
  0x44   :  { %1046 = vmatpush3.bf16.msra.mxu1 %v1043_v10  ;;  %1054 = vmatpush3.bf16.msra.mxu0 %v1051_v22  ;;  %v679_v22 = vld [vmem:[%s1409_s9 + $0x18] sm:$0xff] }
  0x45   :  { %1048 = vmatprep.subr.bf16.mxu1 %v1047_v19  ;;  %1056 = vmatprep.subr.bf16.mxu0 %v1055_v50 }
  0x46   :  { %947 = vmatmul.mubr.msk.f32.gmra.mrb[2].mxu0 %vm94_vm0, %v78_v15  ;;  %953 = vmatmul.mubr.msk.f32.gmra.mrb[2].mxu1 %vm94_vm0, %v82_v16 }
  0x48   :  { %1050 = vmatpush3.bf16.msra.mxu1 %v1047_v19  ;;  %1058 = vmatpush3.bf16.msra.mxu0 %v1055_v50  ;;  %v677_v19 = vld [vmem:[%s1409_s9 + $0x8] sm:$0xff] }
  0x49   :  { %1060 = vmatprep.subr.bf16.mxu1 %v1059_v54  ;;  %v1067_v21 = vpack.c.bf16 %v677_v19, %v676_v18 }
  0x4b   :  { %1068 = vmatprep.subr.bf16.mxu0 %v1067_v21 }
 0x115   :  { %v945_v24 = vpop.f32.mrb[0].mxu0  ;;  %v951_v25 = vpop.f32.mrb[0].mxu1 }
 0x116   :  { %v191_v26 = vadd.f32 %v945_v24, %v830_v23  ;;  %v185_v27 = vpop.f32.mrb[1].mxu0  ;;  %v205_v28 = vpop.f32.mrb[1].mxu1  ;;  %v211_v43 = vadd.f32 %v951_v25, %v830_v23  ;;  %v848_v24 = vld [vmem:[#allocation2] ss:$0 sm:$0xff] }
 0x117   :  { %v186_v29 = vadd.f32 %v830_v23, %v185_v27  ;;  %v206_v32 = vadd.f32 %v830_v23, %v205_v28 }
 0x118   :  { %v225_v34 = vmax.f32 %v191_v26, 0.0  ;;  %v229_v45 = vmax.f32 %v211_v43, 0.0 }
 0x119   :  { %v224_v30 = vmax.f32 %v186_v29, 0.0  ;;  %v948_v31 = vpop.f32.mrb[2].mxu0  ;;  %v954_v33 = vpop.f32.mrb[2].mxu1  ;;  %v228_v40 = vmax.f32 %v206_v32, 0.0 }
 0x11a   :  { %v201_v35 = vadd.f32 %v948_v31, %v830_v23  ;;  %v195_v36 = vpop.f32.mrb[3].mxu0  ;;  %v215_v37 = vpop.f32.mrb[3].mxu1  ;;  %v221_v46 = vadd.f32 %v954_v33, %v830_v23 }
 0x11b   :  { %v196_v38 = vadd.f32 %v830_v23, %v195_v36  ;;  %963 = vmatprep.mubr.msk.f32.mxu1 %vm94_vm0, %v224_v30  ;;  %v216_v41 = vadd.f32 %v830_v23, %v215_v37  ;;  %v1071_v23 = vpack.c.bf16 %v679_v22, %v678_v20 }
 0x11c   :  { %964 = vmatmul.mubr.msk.f32.vlgmr.msra.gmra.mrb[4].mxu1 %vm94_vm0, %v225_v34  ;;  %v227_v42 = vmax.f32 %v201_v35, 0.0  ;;  %v231_v47 = vmax.f32 %v221_v46, 0.0 }
 0x11d   :  { %v226_v39 = vmax.f32 %v196_v38, 0.0  ;;  %v230_v44 = vmax.f32 %v216_v41, 0.0  ;;  %1062 = vmatpush3.bf16.msra.mxu1 %v1059_v54 }
 0x11e   :  { %1064 = vmatprep.subr.bf16.mxu1 %v1063_v56 }
 0x11f   :  { %966 = vmatprep.mubr.msk.f32.mxu1 %vm94_vm0, %v226_v39 }
 0x120   :  { %967 = vmatmul.mubr.msk.f32.gmra.mrb[6].mxu1 %vm94_vm0, %v227_v42 }
 0x121   :  { %969 = vmatprep.mubr.msk.f32.mxu1 %vm94_vm0, %v228_v40  ;;  %1066 = vmatpush3.bf16.msra.mxu1 %v1063_v56 }
 0x124   :  { %970 = vmatmul.mubr.msk.f32.gmra.mrb[8].mxu1 %vm94_vm0, %v229_v45 }
 0x125   :  { %972 = vmatprep.mubr.msk.f32.mxu1 %vm94_vm0, %v230_v44 }
 0x128   :  { %973 = vmatmul.mubr.msk.f32.gmra.mrb[10].mxu1 %vm94_vm0, %v231_v47 }
 0x1ef   :  { %v965_v58 = vpop.f32.mrb[4].mxu1 }
 0x1f0   :  { %v339_v59 = vadd.f32 %v965_v58, %v839_v57  ;;  %v333_v60 = vpop.f32.mrb[5].mxu1 }
 0x1f1   :  { %v334_v61 = vadd.f32 %v839_v57, %v333_v60 }
 0x1f2   :  { %v373_v0 = vmax.f32 %v339_v59, 0.0 }
 0x1f3   :  { %v372_v62 = vmax.f32 %v334_v61, 0.0  ;;  %v968_v63 = vpop.f32.mrb[6].mxu1 }
 0x1f4   :  { %v349_v1 = vadd.f32 %v968_v63, %v839_v57  ;;  %v343_v2 = vpop.f32.mrb[7].mxu1 }
 0x1f5   :  { %v344_v3 = vadd.f32 %v839_v57, %v343_v2  ;;  %983 = vmatprep.mubr.msk.f32.mxu0 %vm94_vm0, %v372_v62 }
 0x1f6   :  { %984 = vmatmul.mubr.msk.f32.vlgmr.msra.gmra.mrb[4].mxu0 %vm94_vm0, %v373_v0  ;;  %v375_v6 = vmax.f32 %v349_v1, 0.0 }
 0x1f7   :  { %v374_v4 = vmax.f32 %v344_v3, 0.0  ;;  %v971_v5 = vpop.f32.mrb[8].mxu1  ;;  %1070 = vmatpush3.bf16.msra.mxu0 %v1067_v21 }
 0x1f8   :  { %v359_v7 = vadd.f32 %v971_v5, %v839_v57  ;;  %v353_v8 = vpop.f32.mrb[9].mxu1  ;;  %1072 = vmatprep.subr.bf16.mxu0 %v1071_v23 }
 0x1f9   :  { %v354_v9 = vadd.f32 %v839_v57, %v353_v8  ;;  %986 = vmatprep.mubr.msk.f32.mxu0 %vm94_vm0, %v374_v4 }
 0x1fa   :  { %987 = vmatmul.mubr.msk.f32.gmra.mrb[6].mxu0 %vm94_vm0, %v375_v6  ;;  %v377_v12 = vmax.f32 %v359_v7, 0.0 }
 0x1fb   :  { %v376_v10 = vmax.f32 %v354_v9, 0.0  ;;  %v974_v11 = vpop.f32.mrb[10].mxu1  ;;  %1074 = vmatpush3.bf16.msra.mxu0 %v1071_v23 }
 0x1fc   :  { %v369_v13 = vadd.f32 %v974_v11, %v839_v57  ;;  %v363_v14 = vpop.f32.mrb[11].mxu1 }
 0x1fd   :  { %v364_v15 = vadd.f32 %v839_v57, %v363_v14  ;;  %989 = vmatprep.mubr.msk.f32.mxu0 %vm94_vm0, %v376_v10  ;;  %v866_v10 = vld [vmem:[%s1410_s10] ss:$0 sm:$0xff] }
 0x1fe   :  { %990 = vmatmul.mubr.msk.f32.gmra.mrb[8].mxu0 %vm94_vm0, %v377_v12  ;;  %v379_v17 = vmax.f32 %v369_v13, 0.0 }
 0x1ff   :  { %v378_v16 = vmax.f32 %v364_v15, 0.0 }
 0x201   :  { %992 = vmatprep.mubr.msk.f32.mxu0 %vm94_vm0, %v378_v16 }
 0x202   :  { %993 = vmatmul.mubr.msk.f32.gmra.mrb[10].mxu0 %vm94_vm0, %v379_v17 }
 0x2c9   :  { %v985_v25 = vpop.f32.mrb[4].mxu0 }
 0x2ca   :  { %v487_v26 = vadd.f32 %v985_v25, %v848_v24  ;;  %v481_v27 = vpop.f32.mrb[5].mxu0 }
 0x2cb   :  { %v482_v28 = vadd.f32 %v848_v24, %v481_v27 }
 0x2cc   :  { %v521_v31 = vmax.f32 %v487_v26, 0.0 }
 0x2cd   :  { %v520_v29 = vmax.f32 %v482_v28, 0.0  ;;  %v988_v30 = vpop.f32.mrb[6].mxu0 }
 0x2ce   :  { %v497_v32 = vadd.f32 %v988_v30, %v848_v24  ;;  %v491_v33 = vpop.f32.mrb[7].mxu0 }
 0x2cf   :  { %v492_v34 = vadd.f32 %v848_v24, %v491_v33  ;;  %1003 = vmatprep.mubr.msk.f32.mxu1 %vm94_vm0, %v520_v29 }
 0x2d0   :  { %1004 = vmatmul.mubr.msk.f32.vlgmr.msra.gmra.mrb[12].mxu1 %vm94_vm0, %v521_v31  ;;  %v523_v37 = vmax.f32 %v497_v32, 0.0 }
 0x2d1   :  { %v522_v35 = vmax.f32 %v492_v34, 0.0  ;;  %v991_v36 = vpop.f32.mrb[8].mxu0 }
 0x2d2   :  { %v507_v38 = vadd.f32 %v991_v36, %v848_v24  ;;  %v501_v39 = vpop.f32.mrb[9].mxu0 }
 0x2d3   :  { %v502_v40 = vadd.f32 %v848_v24, %v501_v39  ;;  %1006 = vmatprep.mubr.msk.f32.mxu1 %vm94_vm0, %v522_v35 }
 0x2d4   :  { %1007 = vmatmul.mubr.msk.f32.gmra.mrb[14].mxu1 %vm94_vm0, %v523_v37  ;;  %v525_v43 = vmax.f32 %v507_v38, 0.0 }
 0x2d5   :  { %v524_v41 = vmax.f32 %v502_v40, 0.0  ;;  %v994_v42 = vpop.f32.mrb[10].mxu0 }
 0x2d6   :  { %v517_v44 = vadd.f32 %v994_v42, %v848_v24  ;;  %v511_v45 = vpop.f32.mrb[11].mxu0 }
 0x2d7   :  { %v512_v46 = vadd.f32 %v848_v24, %v511_v45  ;;  %1009 = vmatprep.mubr.msk.f32.mxu1 %vm94_vm0, %v524_v41 }
 0x2d8   :  { %1010 = vmatmul.mubr.msk.f32.gmra.mrb[16].mxu1 %vm94_vm0, %v525_v43  ;;  %v527_v48 = vmax.f32 %v517_v44, 0.0 }
 0x2d9   :  { %v526_v47 = vmax.f32 %v512_v46, 0.0 }
 0x2db   :  { %1012 = vmatprep.mubr.msk.f32.mxu1 %vm94_vm0, %v526_v47 }
 0x2dc   :  { %1013 = vmatmul.mubr.msk.f32.gmra.mrb[18].mxu1 %vm94_vm0, %v527_v48 }
 0x3a3   :  { %v1005_v50 = vpop.f32.mrb[12].mxu1 }
 0x3a4   :  { %v635_v51 = vadd.f32 %v1005_v50, %v857_v49  ;;  %v629_v52 = vpop.f32.mrb[13].mxu1 }
 0x3a5   :  { %v630_v53 = vadd.f32 %v857_v49, %v629_v52 }
 0x3a6   :  { %v669_v56 = vmax.f32 %v635_v51, 0.0 }
 0x3a7   :  { %v668_v54 = vmax.f32 %v630_v53, 0.0  ;;  %v1008_v55 = vpop.f32.mrb[14].mxu1 }
 0x3a8   :  { %v645_v57 = vadd.f32 %v1008_v55, %v857_v49  ;;  %v639_v58 = vpop.f32.mrb[15].mxu1 }
 0x3a9   :  { %v640_v59 = vadd.f32 %v857_v49, %v639_v58  ;;  %1023 = vmatprep.mubr.msk.f32.mxu0 %vm94_vm0, %v668_v54 }
 0x3aa   :  { %1024 = vmatmul.mubr.msk.f32.vlgmr.msra.gmra.mrb[12].mxu0 %vm94_vm0, %v669_v56  ;;  %v671_v62 = vmax.f32 %v645_v57, 0.0 }
 0x3ab   :  { %v670_v60 = vmax.f32 %v640_v59, 0.0  ;;  %v1011_v61 = vpop.f32.mrb[16].mxu1 }
 0x3ac   :  { %v655_v63 = vadd.f32 %v1011_v61, %v857_v49  ;;  %v649_v0 = vpop.f32.mrb[17].mxu1 }
 0x3ad   :  { %v650_v1 = vadd.f32 %v857_v49, %v649_v0  ;;  %1026 = vmatprep.mubr.msk.f32.mxu0 %vm94_vm0, %v670_v60 }
 0x3ae   :  { %1027 = vmatmul.mubr.msk.f32.gmra.mrb[14].mxu0 %vm94_vm0, %v671_v62  ;;  %v673_v4 = vmax.f32 %v655_v63, 0.0 }
 0x3af   :  { %v672_v2 = vmax.f32 %v650_v1, 0.0  ;;  %v1014_v3 = vpop.f32.mrb[18].mxu1 }
 0x3b0   :  { %v665_v5 = vadd.f32 %v1014_v3, %v857_v49  ;;  %v659_v6 = vpop.f32.mrb[19].mxu1 }
 0x3b1   :  { %v660_v7 = vadd.f32 %v857_v49, %v659_v6  ;;  %1029 = vmatprep.mubr.msk.f32.mxu0 %vm94_vm0, %v672_v2 }
 0x3b2   :  { %1030 = vmatmul.mubr.msk.f32.gmra.mrb[16].mxu0 %vm94_vm0, %v673_v4  ;;  %v675_v9 = vmax.f32 %v665_v5, 0.0 }
 0x3b3   :  { %v674_v8 = vmax.f32 %v660_v7, 0.0 }
 0x3b5   :  { %1032 = vmatprep.mubr.msk.f32.mxu0 %vm94_vm0, %v674_v8 }
 0x3b6   :  { %1033 = vmatmul.mubr.msk.f32.gmra.mrb[18].mxu0 %vm94_vm0, %v675_v9 }
 0x47d   :  { %v1025_v11 = vpop.f32.mrb[12].mxu0 }
 0x47e   :  { %v783_v12 = vadd.f32 %v1025_v11, %v866_v10  ;;  %v777_v13 = vpop.f32.mrb[13].mxu0 }
 0x47f   :  { %v778_v14 = vadd.f32 %v866_v10, %v777_v13 }
 0x480   :  { %817 = vst [vmem:[%s1411_s11 + $0x8] sm:$0xff] %v783_v12 }
 0x481   :  { %816 = vst [vmem:[%s1411_s11] sm:$0xff] %v778_v14  ;;  %v1028_v15 = vpop.f32.mrb[14].mxu0 }
 0x482   :  { %v793_v16 = vadd.f32 %v1028_v15, %v866_v10  ;;  %v787_v17 = vpop.f32.mrb[15].mxu0 }
 0x483   :  { %v788_v18 = vadd.f32 %v866_v10, %v787_v17 }
 0x484   :  { %819 = vst [vmem:[%s1411_s11 + $0x18] sm:$0xff] %v793_v16 }
 0x485   :  { %818 = vst [vmem:[%s1411_s11 + $0x10] sm:$0xff] %v788_v18  ;;  %v1031_v19 = vpop.f32.mrb[16].mxu0 }
 0x486   :  { %v803_v20 = vadd.f32 %v1031_v19, %v866_v10  ;;  %v797_v21 = vpop.f32.mrb[17].mxu0 }
 0x487   :  { %v798_v22 = vadd.f32 %v866_v10, %v797_v21 }
 0x488   :  { %821 = vst [vmem:[%s1411_s11 + $0x28] sm:$0xff] %v803_v20 }
 0x489   :  { %820 = vst [vmem:[%s1411_s11 + $0x20] sm:$0xff] %v798_v22  ;;  %v1034_v23 = vpop.f32.mrb[18].mxu0 }
 0x48a   :  { %v813_v24 = vadd.f32 %v1034_v23, %v866_v10  ;;  %v807_v25 = vpop.f32.mrb[19].mxu0 }
 0x48b   :  { %v808_v26 = vadd.f32 %v866_v10, %v807_v25 }
 0x48c   :  { %823 = vst [vmem:[%s1411_s11 + $0x38] sm:$0xff] %v813_v24 }
 0x48d   :  { %822 = vst [vmem:[%s1411_s11 + $0x30] sm:$0xff] %v808_v26 }
 0x48e   :  { %828 = vsyncpa [#allocation3], 1 }
 0x48f   :  { %829 = vsyncpa [#allocation5], 1 }

</bundles_post_ra>
